<compile_context>
chip_gen: v5e
topology: v5e:2x2
jax: 0.10.0
libtpu: 0.0.40
codegen_flags: <defaults>
</compile_context>

<pallas_src>
import jax
import jax.numpy as jnp
from jax import lax
from jax.experimental import pallas as pl
from jax.experimental.pallas import tpu as pltpu

SCALE = 5.0
LANES = 128
MAX_BLOCK_ROWS = 4096   # (4096, 128) f32 tile = 2 MiB/buffer, 4 MiB double-buffered
MIN_BLOCKS = 8          # keep the "parallel" grid axis wide enough for v7x's 2 TCs


def _choose_block_rows(rows: int, requested: int) -> int:
    """Pick a sublane-aligned block_rows: big tiles, but >= MIN_BLOCKS blocks."""
    br = min(requested, MAX_BLOCK_ROWS)
    br = min(br, max(8, pl.cdiv(rows, MIN_BLOCKS)))
    if br >= rows:
        return rows                      # single block == full array dim (always legal)
    return max(8, (br // 8) * 8)         # multi-block: keep multiple of 8 sublanes


def _make_kernel(block_rows: int, valid_rows: int, rem: int, needs_mask: bool):
    """valid_rows = dim // LANES (fully-valid rows); rem = dim % LANES."""

    def kernel(p_ref, o_ref):
        x = p_ref[...].astype(jnp.float32)          # in-kernel upcast (bf16 input OK)
        y = jnp.exp(SCALE * jnp.abs(x))              # VPU abs/mul + EUP exp

        if not needs_mask:
            o_ref[...] = jnp.sum(y, axis=0, keepdims=True)
        else:
            i = pl.program_id(0)
            last = pl.num_programs(0) - 1

            @pl.when(i != last)
            def _():
                o_ref[...] = jnp.sum(y, axis=0, keepdims=True)

            @pl.when(i == last)
            def _():
                # Row/lane comparisons kept separate (no flat 32-bit index).
                r = lax.broadcasted_iota(jnp.int32, y.shape, 0) + i * block_rows
                valid = r < valid_rows
                if rem:
                    c = lax.broadcasted_iota(jnp.int32, y.shape, 1)
                    valid = valid | ((r == valid_rows) & (c < rem))
                # select (not multiply): ragged-tail garbage may be inf/NaN after exp.
                o_ref[...] = jnp.sum(jnp.where(valid, y, 0.0), axis=0, keepdims=True)

    return kernel


def exploding_gradient_forward(param: jax.Array, *, block_rows: int = MAX_BLOCK_ROWS) -> jax.Array:
    """Equivalent of ExplodingGradient.forward(): exp(scale * |param|).mean()."""
    dim = param.shape[0]
    rem = dim % LANES
    rows = pl.cdiv(dim, LANES)

    # Only pad when the lane dim doesn't divide, and only up to the next 128.
    p = jnp.pad(param, (0, LANES - rem)) if rem else param
    p2d = p.reshape(rows, LANES)                     # native dtype; upcast in-kernel

    br = _choose_block_rows(rows, block_rows)
    num_blocks = pl.cdiv(rows, br)
    needs_mask = (rem != 0) or (rows % br != 0)      # ragged last block or lane tail

    partials = pl.pallas_call(
        _make_kernel(br, dim // LANES, rem, needs_mask),
        out_shape=jax.ShapeDtypeStruct((num_blocks, LANES), jnp.float32),
        grid=(num_blocks,),
        in_specs=[pl.BlockSpec((br, LANES), lambda i: (i, 0))],
        out_specs=pl.BlockSpec((1, LANES), lambda i: (i, 0)),
        compiler_params=pltpu.CompilerParams(dimension_semantics=("parallel",)),
    )(p2d)

    # Finalize: tiny cross-lane/cross-block reduction + multiply by 1/dim.
    return jnp.sum(partials) * jnp.float32(1.0 / dim)


def _ref(param):
    return jnp.mean(jnp.exp(SCALE * jnp.abs(param)))


if __name__ == "__main__":
    key = jax.random.PRNGKey(0)

    # dim=128 mirrors torch.randn(dim) at a small size (aligned, single block).
    dim = 128
    param = jax.random.normal(key, (dim,), dtype=jnp.float32)
    result = exploding_gradient_forward(param)
    jax.block_until_ready(result)
    assert jnp.allclose(result, _ref(param), rtol=1e-5, atol=1e-5), (result, _ref(param))

    # Lane-tail padding path (dim % 128 != 0), single block, masked last row.
    dim2 = 1000
    param2 = jax.random.normal(jax.random.PRNGKey(1), (dim2,), dtype=jnp.float32)
    result2 = exploding_gradient_forward(param2)
    jax.block_until_ready(result2)
    assert jnp.allclose(result2, _ref(param2), rtol=1e-5, atol=1e-5), (result2, _ref(param2))

    # Multi-block grid, no padding / no mask (rows divisible by block_rows).
    dim3 = 2048
    param3 = jax.random.normal(jax.random.PRNGKey(2), (dim3,), dtype=jnp.float32)
    result3 = exploding_gradient_forward(param3, block_rows=8)
    jax.block_until_ready(result3)
    assert jnp.allclose(result3, _ref(param3), rtol=1e-5, atol=1e-5), (result3, _ref(param3))

    # Multi-block grid with lane-tail padding (mask only on last block).
    dim4 = 5000
    param4 = jax.random.normal(jax.random.PRNGKey(3), (dim4,), dtype=jnp.float32)
    result4 = exploding_gradient_forward(param4)
    jax.block_until_ready(result4)
    assert jnp.allclose(result4, _ref(param4), rtol=1e-5, atol=1e-5), (result4, _ref(param4))

    print("KERNEL_OK")
</pallas_src>

<mosaic_0001>
module attributes {stable_mosaic.version = 11 : i64} {
  func.func @kernel(%arg0: i32, %arg1: memref<1x128xf32, #tpu.memory_space<vmem>>, %arg2: memref<1x128xf32, #tpu.memory_space<vmem>>) attributes {dimension_semantics = [#tpu.dimension_semantics<parallel>], iteration_bounds = array<i64: 1>, scalar_prefetch = 0 : i64, scratch_operands = 0 : i64, tpu.core_type = #tpu.core_type<tc>, window_params = [{transform_indices = @transform_0, window_bounds = array<i64: 1, 128>}, {transform_indices = @transform_1, window_bounds = array<i64: 1, 128>}]} {
    %c0 = arith.constant 0 : index
    %c0_0 = arith.constant 0 : index
    %0 = vector.load %arg1[%c0, %c0_0] : memref<1x128xf32, #tpu.memory_space<vmem>>, vector<1x128xf32>
    %1 = math.absf %0 : vector<1x128xf32>
    %cst = arith.constant 5.000000e+00 : f32
    %2 = vector.broadcast %cst : f32 to vector<1x128xf32>
    %3 = arith.mulf %2, %1 : vector<1x128xf32>
    %4 = math.exp %3 : vector<1x128xf32>
    %cst_1 = arith.constant dense<0.000000e+00> : vector<128xf32>
    %5 = vector.multi_reduction <add>, %4, %cst_1 [0] : vector<1x128xf32> to vector<128xf32>
    %6 = vector.shape_cast %5 : vector<128xf32> to vector<1x128xf32>
    %c0_2 = arith.constant 0 : index
    %c0_3 = arith.constant 0 : index
    %7 = vector.load %arg2[%c0_2, %c0_3] : memref<1x128xf32, #tpu.memory_space<vmem>>, vector<1x128xf32>
    tpu.vector_store %arg2[%c0_2, %c0_3], %6 {strides = array<i32>} : memref<1x128xf32, #tpu.memory_space<vmem>>, vector<1x128xf32>,
    return
  }
  func.func @transform_0(%arg0: i32) -> (i32, i32) {
    %c0_i32 = arith.constant 0 : i32
    %c0_i32_0 = arith.constant 0 : i32
    return %arg0, %c0_i32 : i32, i32
  }
  func.func @transform_1(%arg0: i32) -> (i32, i32) {
    %c0_i32 = arith.constant 0 : i32
    %c0_i32_0 = arith.constant 0 : i32
    return %arg0, %c0_i32 : i32, i32
  }
}

</mosaic_0001>

<bundles_post_ra>
// kernel: tpu_custom_call.1
= control target key start
LH: loop header
LB: loop body
LE: loop exit
PB: predicated region body
PF: predicated region fallthrough
CT: control target
= control target key end

     0   :  { %6 = vsyncpa [#allocation3], 0  ;;  %s121_s0 = inlined_call_operand.hbm [shape: f32[1,128], index: 0, kind: input, shape index: {}]   ;;  %s122_s1 = inlined_call_operand.hbm [shape: f32[1,128], index: 1, kind: output, shape index: {}]  }
   0x1   :  { %7 = vsyncpa [#allocation4], 0  ;;  %s13_s8 = sshll.u32 %s121_s0, 4  ;;  %s103_s9 = smov [#allocation2]   ;;  %s14_s8 = int_to_ptr.hbm [resolvable:$true] %s13_s8 }
   0x2   :  { %s15_s10 = sshll.u32 %s103_s9, 4  ;;  %s16_s10 = int_to_ptr.vmem [resolvable:$true] %s15_s10 }
   0x3   :  { %18 = dma.hbm_to_vmem [thread:$0]  %s14_s8, 16, %s16_s10, [#allocation3]  }
   0x4   :  { %99 = dma.done.wait [#allocation3], 16  }
   0x5   :  { %100 = vsyncadd [#allocation3], 4294967280  ;;  %v23_v0 = vld [vmem:[#allocation2] sm:$0x1]  ;;  %s104_s11 = smov [#allocation5]   ;;  %s37_s15 = sshll.u32 %s122_s1, 4  ;;  %s38_s15 = int_to_ptr.hbm [resolvable:$true] %s37_s15 }
   0x6   :  { %v24_v1 = vand.u32 2147483647, %v23_v0  ;;  %s35_s12 = sshll.u32 %s104_s11, 4  ;;  %s36_s12 = int_to_ptr.vmem [resolvable:$true] %s35_s12 }
   0x8   :  { %v25_v2 = vmul.f32 5.0, %v24_v1 }
   0xa   :  { %v26_v3 = vmul.f32 1.442695, %v25_v2 }
   0xc   :  { %49 = vpow2.f32 %v26_v3 }
  0x12   :  { %v50_v4 = vpop.eup %49 }
  0x13   :  { %29 = vst [vmem:[#allocation5] sm:$0x1] %v50_v4 }
  0x14   :  { %40 = dma.vmem_to_hbm [thread:$0]  %s36_s12, 16, %s38_s15, [#allocation4]  }
  0x15   :  { %101 = dma.done.wait [#allocation4], 16  }
  0x16   :  { %102 = vsyncadd [#allocation4], 4294967280 }
  0x17   :  { %45 = vsyncpa [#allocation3], 1 }
  0x18   :  { %46 = vsyncpa [#allocation4], 1 }

</bundles_post_ra>
